<compile_context>
chip_gen: v5e
topology: v5e:2x2
jax: 0.10.0
libtpu: 0.0.40
codegen_flags: <defaults>
</compile_context>

<pallas_src>
import math

import jax
import jax.numpy as jnp
from jax.experimental import pallas as pl
from jax.experimental.pallas import tpu as pltpu


def gin_kernel(scale_ref, adj_ref, x_ref, w1_ref, b1_ref, w2_ref, b2_ref,
               out_ref, acc_ref):
    i = pl.program_id(0)              # output row-tile
    k = pl.program_id(1)              # reduction (neighbor) tile
    tm = out_ref.shape[0]
    tk = adj_ref.shape[1]

    @pl.when(k == 0)
    def _():
        acc_ref[...] = jnp.zeros_like(acc_ref)

    # Neighbor-sum aggregation tile: A[i, k] @ x[k]
    # A arrives as int8 (0/1), upcast on the VPU (hides under the A DMA),
    # bf16 MXU matmul with f32 accumulation.
    a_tile = adj_ref[...].astype(jnp.bfloat16)
    x_tile = x_ref[pl.ds(pl.multiple_of(k * tk, tk), tk), :]
    acc_ref[...] += jnp.dot(a_tile, x_tile, preferred_element_type=jnp.float32)

    # Finalize: combine (1 + eps) * x_i (from resident x) and run apply_func
    # MLP (Linear -> ReLU -> Linear); lane-dense f32 store.
    @pl.when(k == pl.num_programs(1) - 1)
    def _():
        x_i = x_ref[pl.ds(pl.multiple_of(i * tm, tm), tm), :].astype(jnp.float32)
        h = acc_ref[...] + scale_ref[0, 0] * x_i
        h1 = jnp.dot(h.astype(jnp.bfloat16), w1_ref[...],
                     preferred_element_type=jnp.float32) + b1_ref[...]
        h1 = jnp.maximum(h1, 0.0)
        out = jnp.dot(h1.astype(jnp.bfloat16), w2_ref[...],
                      preferred_element_type=jnp.float32) + b2_ref[...]
        out_ref[...] = out.astype(out_ref.dtype)


def _pad_cast(a, shape, dtype):
    """Pad with zeros / cast only when the stored array doesn't already match."""
    if tuple(a.shape) == tuple(shape) and a.dtype == jnp.dtype(dtype):
        return a
    out = jnp.zeros(shape, dtype)
    sl = tuple(slice(0, s) for s in a.shape)
    return out.at[sl].set(a.astype(dtype))


def gin_layer(eps, adj, x, w1, b1, w2, b2, *, tm=256, tk=512):
    """GIN layer forward.

    adj: [N, N] dense 0/1 adjacency (int8 preferred), x: [N, F_in] node feats.
    eps: shape-(1,) learnable epsilon (as in the PyTorch module).
    """
    n, f_in = x.shape
    hidden = w1.shape[1]
    f_out = w2.shape[1]
    lane = 128

    def rup(v, m):
        return -(-v // m) * m

    # Clamp tiles to the (128-aligned) problem size, then pad N so both tile
    # sizes divide it.  tm/tk should stay power-of-two multiples of 128.
    n_min = rup(n, lane)
    tm = min(tm, n_min)
    tk = min(tk, n_min)
    n_p = rup(n, math.lcm(tm, tk))
    f_p = rup(f_in, lane)
    h_p = rup(hidden, lane)
    o_p = rup(f_out, lane)

    # Operand prep (no-ops when the caller already stores kernel-ready arrays).
    adj_p = _pad_cast(adj, (n_p, n_p), jnp.int8)          # 0/1 adjacency, narrow HBM stream
    x_p = _pad_cast(x, (n_p, f_p), jnp.bfloat16)          # resident in VMEM
    w1_p = _pad_cast(w1, (f_p, h_p), jnp.bfloat16)
    b1_p = _pad_cast(b1.reshape(1, -1), (1, h_p), jnp.float32)
    w2_p = _pad_cast(w2, (h_p, o_p), jnp.bfloat16)
    b2_p = _pad_cast(b2.reshape(1, -1), (1, o_p), jnp.float32)
    # (1 + eps) as a single f32 SMEM scalar (exact for any eps).
    scale = jnp.reshape(1.0 + eps.astype(jnp.float32).reshape(-1)[0], (1, 1))

    grid = (n_p // tm, n_p // tk)

    # VMEM budget (double-buffered streams + resident operands) with headroom;
    # capped below v7x's 64 MiB physical VMEM.
    vmem_bytes = (2 * tm * tk                        # A int8 double-buffer
                  + n_p * f_p * 2                    # resident x (bf16)
                  + tm * f_p * 4                     # f32 accumulator scratch
                  + 2 * tm * o_p * 4                 # output f32 double-buffer
                  + f_p * h_p * 2 + h_p * o_p * 2    # MLP weights
                  + (h_p + o_p) * 4)                 # biases
    vmem_limit = int(min(max(2 * vmem_bytes, 16 * 1024 * 1024), 48 * 1024 * 1024))

    out_p = pl.pallas_call(
        gin_kernel,
        out_shape=jax.ShapeDtypeStruct((n_p, o_p), jnp.float32),
        grid_spec=pltpu.PrefetchScalarGridSpec(
            num_scalar_prefetch=0,
            grid=grid,
            in_specs=[
                pl.BlockSpec(memory_space=pltpu.MemorySpace.SMEM),   # (1+eps) scalar
                pl.BlockSpec((tm, tk), lambda i, k: (i, k)),         # A tile (int8)
                pl.BlockSpec((n_p, f_p), lambda i, k: (0, 0)),       # x, VMEM-resident
                pl.BlockSpec((f_p, h_p), lambda i, k: (0, 0)),       # W1 (tiny, resident)
                pl.BlockSpec((1, h_p), lambda i, k: (0, 0)),         # b1
                pl.BlockSpec((h_p, o_p), lambda i, k: (0, 0)),       # W2
                pl.BlockSpec((1, o_p), lambda i, k: (0, 0)),         # b2
            ],
            out_specs=pl.BlockSpec((tm, o_p), lambda i, k: (i, 0)),
            scratch_shapes=[pltpu.VMEM((tm, f_p), jnp.float32)],     # agg accumulator
        ),
        compiler_params=pltpu.CompilerParams(
            dimension_semantics=("parallel", "arbitrary"),
            vmem_limit_bytes=vmem_limit),
    )(scale, adj_p, x_p, w1_p, b1_p, w2_p, b2_p)

    return out_p[:n, :f_out]


def gin_reference(eps, adj, x, w1, b1, w2, b2):
    # Pure-JAX reference with the same bf16-matmul / f32-accumulate numerics.
    x_bf = x.astype(jnp.bfloat16)
    agg = jnp.dot(adj.astype(jnp.bfloat16), x_bf,
                  preferred_element_type=jnp.float32)
    h = (1.0 + eps.reshape(-1)[0]) * x_bf.astype(jnp.float32) + agg
    h1 = jnp.maximum(
        jnp.dot(h.astype(jnp.bfloat16), w1.astype(jnp.bfloat16),
                preferred_element_type=jnp.float32) + b1.reshape(1, -1), 0.0)
    return jnp.dot(h1.astype(jnp.bfloat16), w2.astype(jnp.bfloat16),
                   preferred_element_type=jnp.float32) + b2.reshape(1, -1)


if __name__ == "__main__":
    key = jax.random.PRNGKey(0)
    k_adj, k_x, k_w1, k_w2 = jax.random.split(key, 4)

    N, F_IN, HIDDEN, F_OUT = 256, 32, 32, 32

    # Deterministic random undirected graph; adjacency stored directly as int8
    # (0/1, no self loops) so the wrapper does no per-call pad/cast pass.
    a = (jax.random.uniform(k_adj, (N, N)) < 0.05).astype(jnp.float32)
    adj_f = jnp.clip(a + a.T, 0.0, 1.0) * (1.0 - jnp.eye(N, dtype=jnp.float32))
    adj = adj_f.astype(jnp.int8)

    x = jax.random.normal(k_x, (N, F_IN), dtype=jnp.float32)

    # GINLayer params: eps initialized to 0 (module default, train_eps=True)
    eps = jnp.array([0.0], dtype=jnp.float32)
    # apply_func (MLP) params, deterministic init
    w1 = jax.random.normal(k_w1, (F_IN, HIDDEN), dtype=jnp.float32) * 0.1
    b1 = jnp.zeros((1, HIDDEN), dtype=jnp.float32)
    w2 = jax.random.normal(k_w2, (HIDDEN, F_OUT), dtype=jnp.float32) * 0.1
    b2 = jnp.zeros((1, F_OUT), dtype=jnp.float32)

    out = gin_layer(eps, adj, x, w1, b1, w2, b2)
    jax.block_until_ready(out)

    ref = gin_reference(eps, adj_f, x, w1, b1, w2, b2)
    assert out.shape == (N, F_OUT)
    assert jnp.allclose(out, ref, atol=2e-2, rtol=2e-2)

    print("KERNEL_OK")
</pallas_src>

<mosaic_0001>
module attributes {stable_mosaic.version = 11 : i64} {
  func.func @gin_kernel(%arg0: i32, %arg1: i32, %arg2: memref<1x1xf32, #tpu.memory_space<smem>>, %arg3: memref<256x256xi8, #tpu.memory_space<vmem>>, %arg4: memref<256x128xbf16, #tpu.memory_space<vmem>>, %arg5: memref<128x128xbf16, #tpu.memory_space<vmem>>, %arg6: memref<1x128xf32, #tpu.memory_space<vmem>>, %arg7: memref<128x128xbf16, #tpu.memory_space<vmem>>, %arg8: memref<1x128xf32, #tpu.memory_space<vmem>>, %arg9: memref<256x128xf32, #tpu.memory_space<vmem>>, %arg10: memref<256x128xf32, #tpu.memory_space<vmem>>) attributes {dimension_semantics = [#tpu.dimension_semantics<parallel>, #tpu.dimension_semantics<arbitrary>], iteration_bounds = array<i64: 1, 1>, scalar_prefetch = 0 : i64, scratch_operands = 1 : i64, tpu.core_type = #tpu.core_type<tc>, window_params = [{transform_indices = @transform_0, window_bounds = array<i64: 1, 1>}, {transform_indices = @transform_1, window_bounds = array<i64: 256, 256>}, {pipeline_mode = #tpu.pipeline_mode<synchronous>, transform_indices = @transform_2, window_bounds = array<i64: 256, 128>}, {pipeline_mode = #tpu.pipeline_mode<synchronous>, transform_indices = @transform_3, window_bounds = array<i64: 128, 128>}, {pipeline_mode = #tpu.pipeline_mode<synchronous>, transform_indices = @transform_4, window_bounds = array<i64: 1, 128>}, {pipeline_mode = #tpu.pipeline_mode<synchronous>, transform_indices = @transform_5, window_bounds = array<i64: 128, 128>}, {pipeline_mode = #tpu.pipeline_mode<synchronous>, transform_indices = @transform_6, window_bounds = array<i64: 1, 128>}, {transform_indices = @transform_7, window_bounds = array<i64: 256, 128>}]} {
    %c0_i32 = arith.constant 0 : i32
    %0 = arith.cmpi eq, %arg1, %c0_i32 : i32
    %1 = arith.extui %0 : i1 to i32
    %c0_i32_0 = arith.constant 0 : i32
    %2 = arith.cmpi ne, %1, %c0_i32_0 : i32
    scf.if %2 {
      %cst_9 = arith.constant 0.000000e+00 : f32
      %16 = vector.broadcast %cst_9 : f32 to vector<256x128xf32>
      %c0_10 = arith.constant 0 : index
      %c0_11 = arith.constant 0 : index
      %17 = vector.load %arg10[%c0_10, %c0_11] : memref<256x128xf32, #tpu.memory_space<vmem>>, vector<256x128xf32>
      tpu.vector_store %arg10[%c0_10, %c0_11], %16 {strides = array<i32>} : memref<256x128xf32, #tpu.memory_space<vmem>>, vector<256x128xf32>,
    } else {
    }
    %c0 = arith.constant 0 : index
    %c0_1 = arith.constant 0 : index
    %3 = vector.load %arg3[%c0, %c0_1] : memref<256x256xi8, #tpu.memory_space<vmem>>, vector<256x256xi8>
    %4 = arith.sitofp %3 : vector<256x256xi8> to vector<256x256xbf16>
    %c256_i32 = arith.constant 256 : i32
    %5 = arith.muli %arg1, %c256_i32 : i32
    %6 = tpu.assume_multiple %5, 256 : i32
    %7 = arith.index_cast %6 : i32 to index
    %c0_2 = arith.constant 0 : index
    %8 = vector.load %arg4[%7, %c0_2] : memref<256x128xbf16, #tpu.memory_space<vmem>>, vector<256x128xbf16>
    %c0_3 = arith.constant 0 : index
    %c0_4 = arith.constant 0 : index
    %9 = vector.load %arg10[%c0_3, %c0_4] : memref<256x128xf32, #tpu.memory_space<vmem>>, vector<256x128xf32>
    %cst = arith.constant dense<0.000000e+00> : vector<256x128xf32>
    %10 = tpu.matmul %4, %8, %cst {dimension_numbers = #tpu.dot_dimension_numbers<[1], [0], [0], [1], [0, 0, 1, 1], [], []>} : vector<256x256xbf16>, vector<256x128xbf16>, vector<256x128xf32> -> vector<256x128xf32>
    %11 = arith.addf %9, %10 : vector<256x128xf32>
    %c0_5 = arith.constant 0 : index
    %c0_6 = arith.constant 0 : index
    %12 = vector.load %arg10[%c0_5, %c0_6] : memref<256x128xf32, #tpu.memory_space<vmem>>, vector<256x128xf32>
    tpu.vector_store %arg10[%c0_5, %c0_6], %11 {strides = array<i32>} : memref<256x128xf32, #tpu.memory_space<vmem>>, vector<256x128xf32>,
    %c0_i32_7 = arith.constant 0 : i32
    %13 = arith.cmpi eq, %arg1, %c0_i32_7 : i32
    %14 = arith.extui %13 : i1 to i32
    %c0_i32_8 = arith.constant 0 : i32
    %15 = arith.cmpi ne, %14, %c0_i32_8 : i32
    scf.if %15 {
      %c256_i32_9 = arith.constant 256 : i32
      %16 = arith.muli %arg0, %c256_i32_9 : i32
      %17 = tpu.assume_multiple %16, 256 : i32
      %18 = arith.index_cast %17 : i32 to index
      %c0_10 = arith.constant 0 : index
      %19 = vector.load %arg4[%18, %c0_10] : memref<256x128xbf16, #tpu.memory_space<vmem>>, vector<256x128xbf16>
      %20 = arith.extf %19 : vector<256x128xbf16> to vector<256x128xf32>
      %c0_11 = arith.constant 0 : index
      %c0_12 = arith.constant 0 : index
      %21 = vector.load %arg10[%c0_11, %c0_12] : memref<256x128xf32, #tpu.memory_space<vmem>>, vector<256x128xf32>
      %c0_13 = arith.constant 0 : index
      %c0_14 = arith.constant 0 : index
      %22 = memref.load %arg2[%c0_13, %c0_14] : memref<1x1xf32, #tpu.memory_space<smem>>
      %23 = vector.broadcast %22 : f32 to vector<256x128xf32>
      %24 = arith.mulf %23, %20 : vector<256x128xf32>
      %25 = arith.addf %21, %24 : vector<256x128xf32>
      %26 = arith.truncf %25 : vector<256x128xf32> to vector<256x128xbf16>
      %c0_15 = arith.constant 0 : index
      %c0_16 = arith.constant 0 : index
      %27 = vector.load %arg5[%c0_15, %c0_16] : memref<128x128xbf16, #tpu.memory_space<vmem>>, vector<128x128xbf16>
      %cst_17 = arith.constant dense<0.000000e+00> : vector<256x128xf32>
      %28 = tpu.matmul %26, %27, %cst_17 {dimension_numbers = #tpu.dot_dimension_numbers<[1], [0], [0], [1], [0, 0, 1, 1], [], []>} : vector<256x128xbf16>, vector<128x128xbf16>, vector<256x128xf32> -> vector<256x128xf32>
      %c0_18 = arith.constant 0 : index
      %c0_19 = arith.constant 0 : index
      %29 = vector.load %arg6[%c0_18, %c0_19] : memref<1x128xf32, #tpu.memory_space<vmem>>, vector<1x128xf32>
      %30 = vector.broadcast %29 : vector<1x128xf32> to vector<256x128xf32>
      %31 = arith.addf %28, %30 : vector<256x128xf32>
      %cst_20 = arith.constant 0.000000e+00 : f32
      %32 = vector.broadcast %cst_20 : f32 to vector<256x128xf32>
      %33 = arith.maximumf %31, %32 : vector<256x128xf32>
      %34 = arith.truncf %33 : vector<256x128xf32> to vector<256x128xbf16>
      %c0_21 = arith.constant 0 : index
      %c0_22 = arith.constant 0 : index
      %35 = vector.load %arg7[%c0_21, %c0_22] : memref<128x128xbf16, #tpu.memory_space<vmem>>, vector<128x128xbf16>
      %cst_23 = arith.constant dense<0.000000e+00> : vector<256x128xf32>
      %36 = tpu.matmul %34, %35, %cst_23 {dimension_numbers = #tpu.dot_dimension_numbers<[1], [0], [0], [1], [0, 0, 1, 1], [], []>} : vector<256x128xbf16>, vector<128x128xbf16>, vector<256x128xf32> -> vector<256x128xf32>
      %c0_24 = arith.constant 0 : index
      %c0_25 = arith.constant 0 : index
      %37 = vector.load %arg8[%c0_24, %c0_25] : memref<1x128xf32, #tpu.memory_space<vmem>>, vector<1x128xf32>
      %38 = vector.broadcast %37 : vector<1x128xf32> to vector<256x128xf32>
      %39 = arith.addf %36, %38 : vector<256x128xf32>
      %c0_26 = arith.constant 0 : index
      %c0_27 = arith.constant 0 : index
      %40 = vector.load %arg9[%c0_26, %c0_27] : memref<256x128xf32, #tpu.memory_space<vmem>>, vector<256x128xf32>
      tpu.vector_store %arg9[%c0_26, %c0_27], %39 {strides = array<i32>} : memref<256x128xf32, #tpu.memory_space<vmem>>, vector<256x128xf32>,
    } else {
    }
    return
  }
  func.func @transform_0(%arg0: i32, %arg1: i32) -> (i32, i32) {
    %c0_i32 = arith.constant 0 : i32
    %c0_i32_0 = arith.constant 0 : i32
    %c0_i32_1 = arith.constant 0 : i32
    return %c0_i32, %c0_i32_0 : i32, i32
  }
  func.func @transform_1(%arg0: i32, %arg1: i32) -> (i32, i32) {
    %c0_i32 = arith.constant 0 : i32
    return %arg0, %arg1 : i32, i32
  }
  func.func @transform_2(%arg0: i32, %arg1: i32) -> (i32, i32) {
    %c0_i32 = arith.constant 0 : i32
    %c0_i32_0 = arith.constant 0 : i32
    %c0_i32_1 = arith.constant 0 : i32
    return %c0_i32, %c0_i32_0 : i32, i32
  }
  func.func @transform_3(%arg0: i32, %arg1: i32) -> (i32, i32) {
    %c0_i32 = arith.constant 0 : i32
    %c0_i32_0 = arith.constant 0 : i32
    %c0_i32_1 = arith.constant 0 : i32
    return %c0_i32, %c0_i32_0 : i32, i32
  }
  func.func @transform_4(%arg0: i32, %arg1: i32) -> (i32, i32) {
    %c0_i32 = arith.constant 0 : i32
    %c0_i32_0 = arith.constant 0 : i32
    %c0_i32_1 = arith.constant 0 : i32
    return %c0_i32, %c0_i32_0 : i32, i32
  }
  func.func @transform_5(%arg0: i32, %arg1: i32) -> (i32, i32) {
    %c0_i32 = arith.constant 0 : i32
    %c0_i32_0 = arith.constant 0 : i32
    %c0_i32_1 = arith.constant 0 : i32
    return %c0_i32, %c0_i32_0 : i32, i32
  }
  func.func @transform_6(%arg0: i32, %arg1: i32) -> (i32, i32) {
    %c0_i32 = arith.constant 0 : i32
    %c0_i32_0 = arith.constant 0 : i32
    %c0_i32_1 = arith.constant 0 : i32
    return %c0_i32, %c0_i32_0 : i32, i32
  }
  func.func @transform_7(%arg0: i32, %arg1: i32) -> (i32, i32) {
    %c0_i32 = arith.constant 0 : i32
    %c0_i32_0 = arith.constant 0 : i32
    return %arg0, %c0_i32 : i32, i32
  }
}

</mosaic_0001>

<bundles_post_ra>
// kernel: tpu_custom_call.1
= control target key start
LH: loop header
LB: loop body
LE: loop exit
PB: predicated region body
PF: predicated region fallthrough
CT: control target
= control target key end

     0   :  { %13 = vsyncpa [#allocation5], 0  ;;  %s1872_s0 = inlined_call_operand.<no memory space> [shape: f32[1,1], index: 0, kind: input, shape index: {}]   ;;  %s1873_s1 = inlined_call_operand.hbm [shape: s8[256,256], index: 1, kind: input, shape index: {}]   ;;  %s1874_s2 = inlined_call_operand.hbm [shape: bf16[256,128], index: 2, kind: input, shape index: {}]   ;;  %s1875_s3 = inlined_call_operand.hbm [shape: bf16[128,128], index: 3, kind: input, shape index: {}]   ;;  %s1876_s4 = inlined_call_operand.vmem [shape: f32[1,128], index: 4, kind: input, shape index: {}]   ;;  %s1877_s5 = inlined_call_operand.hbm [shape: bf16[128,128], index: 5, kind: input, shape index: {}]   ;;  %s1878_s6 = inlined_call_operand.vmem [shape: f32[1,128], index: 6, kind: input, shape index: {}]   ;;  %s1879_s7 = inlined_call_operand.hbm [shape: f32[256,128], index: 7, kind: output, shape index: {}]  }
   0x1   :  { %14 = vsyncpa [#allocation8], 0 }
   0x2   :  { %15 = vsyncpa [#allocation11], 0  ;;  %s36_s26 = sshll.u32 %s1874_s2, 4  ;;  %s37_s26 = int_to_ptr.hbm [resolvable:$true] %s36_s26 }
   0x3   :  { %16 = vsyncpa [#allocation6], 0  ;;  %s1695_s27 = smov [#allocation7]   ;;  %s23_s8 = sshll.u32 %s1873_s1, 4  ;;  %s24_s8 = int_to_ptr.hbm [resolvable:$true] %s23_s8 }
   0x4   :  { %s38_s28 = sshll.u32 %s1695_s27, 4  ;;  %s1696_s9 = smov 64   ;;  %s39_s28 = int_to_ptr.vmem [resolvable:$true] %s38_s28 }
   0x5   :  { %s1697_s10 = smov 4   ;;  %s1698_s11 = smov [#allocation4]  }
   0x6   :  { %44 = dma.hbm_to_vmem [thread:$0]  %s37_s26, 2048, %s39_s28, [#allocation8], %s1696_s9, %s1696_s9, %s1697_s10  }
   0x7   :  { %s25_s12 = sshll.u32 %s1698_s11, 4  ;;  %s1699_s13 = smov 256   ;;  %s26_s12 = int_to_ptr.vmem [resolvable:$true] %s25_s12 }
   0x8   :  { %s1700_s14 = smov 16   ;;  %s49_s16 = sshll.u32 %s1875_s3, 4  ;;  %s50_s16 = int_to_ptr.hbm [resolvable:$true] %s49_s16 }
   0x9   :  { %31 = dma.hbm_to_vmem [thread:$0]  %s24_s8, 2048, %s26_s12, [#allocation5], %s1699_s13, %s1699_s13, %s1700_s14  }
   0xa   :  { %s1701_s17 = smov [#allocation9]   ;;  %s64_s20 = sshll.u32 %s1877_s5, 4  ;;  %s65_s20 = int_to_ptr.hbm [resolvable:$true] %s64_s20 }
   0xb   :  { %s51_s18 = sshll.u32 %s1701_s17, 4  ;;  %s1702_s21 = smov [#allocation10]   ;;  %s52_s18 = int_to_ptr.vmem [resolvable:$true] %s51_s18 }
   0xc   :  { %57 = dma.hbm_to_vmem [thread:$0]  %s50_s16, 1024, %s52_s18, [#allocation8], %s1696_s9, %s1696_s9, %s1697_s10  }
   0xd   :  { %s66_s22 = sshll.u32 %s1702_s21, 4  ;;  %s67_s22 = int_to_ptr.vmem [resolvable:$true] %s66_s22 }
   0xe   :  { %72 = dma.hbm_to_vmem [thread:$0]  %s65_s20, 1024, %s67_s22, [#allocation11], %s1696_s9, %s1696_s9, %s1697_s10  }
   0xf   :  { %1687 = dma.done.wait [#allocation5], 2048  }
  0x10   :  { %1688 = vsyncadd [#allocation5], 4294965248 }
  0x11   :  { %1689 = dma.done.wait [#allocation8], 3072  }
  0x12   :  { %1690 = vsyncadd [#allocation8], 4294964224 }
  0x13   :  { %1691 = dma.done.wait [#allocation11], 1024  }
  0x14   :  { %1692 = vsyncadd [#allocation11], 4294966272  ;;  %v1450_v0 = vld [vmem:[#allocation7 + $0x38] sm:$0xff]  ;;  %v1449_v2 = vld [vmem:[#allocation7 + $0x30] sm:$0xff]  ;;  %s1296_s28 = sshll.u32 %s1879_s7, 4  ;;  %s1704_s29 = smov 128   ;;  %s1297_s28 = int_to_ptr.hbm [resolvable:$true] %s1296_s28 }
  0x15   :  { %v1458_v1 = vld [vmem:[#allocation7 + $0x78] sm:$0xff]  ;;  %468 = vmatpush.bf16.msra.mxu0 %v1450_v0  ;;  %v1457_v3 = vld [vmem:[#allocation7 + $0x70] sm:$0xff]  ;;  %v1448_v4 = vld [vmem:[#allocation7 + $0x28] sm:$0xff]  ;;  %s1705_s30 = smov 8  }
  0x16   :  { %557 = vmatpush.bf16.msra.mxu1 %v1458_v1  ;;  %v1456_v5 = vld [vmem:[#allocation7 + $0x68] sm:$0xff]  ;;  %v1447_v6 = vld [vmem:[#allocation7 + $0x20] sm:$0xff]  ;;  %v1446_v8 = vld [vmem:[#allocation7 + $0x18] sm:$0xff] }
  0x17   :  { %v1455_v7 = vld [vmem:[#allocation7 + $0x60] sm:$0xff]  ;;  %v1454_v9 = vld [vmem:[#allocation7 + $0x58] sm:$0xff]  ;;  %v1445_v10 = vld [vmem:[#allocation7 + $0x10] sm:$0xff] }
  0x18   :  { %v1453_v11 = vld [vmem:[#allocation7 + $0x50] sm:$0xff]  ;;  %v127_v12 = vld [vmem:[#allocation4] sm:$0xff]  ;;  %v128_v13 = vld [vmem:[#allocation4 + $0x8] sm:$0xff] }
  0x19   :  { %469 = vmatpush.bf16.msra.mxu0 %v1449_v2  ;;  %v143_v14 = vunpack.c.0.s8 %v127_v12  ;;  %v145_v15 = vunpack.c.1.s8 %v127_v12  ;;  %v144_v16 = vunpack.c.0.s8 %v128_v13  ;;  %v146_v17 = vunpack.c.1.s8 %v128_v13  ;;  %v1444_v18 = vld [vmem:[#allocation7 + $0x8] sm:$0xff]  ;;  %v1443_v24 = vld [vmem:[#allocation7] sm:$0xff]  ;;  %v129_v38 = vld [vmem:[#allocation4 + $0x10] sm:$0xff] }
  0x1a   :  { %558 = vmatpush.bf16.msra.mxu1 %v1457_v3  ;;  %v1452_v19 = vld [vmem:[#allocation7 + $0x48] sm:$0xff]  ;;  %v1451_v25 = vld [vmem:[#allocation7 + $0x40] sm:$0xff]  ;;  %v147_v28 = vunpack.c.2.s8 %v127_v12  ;;  %v149_v29 = vunpack.c.3.s8 %v127_v12  ;;  %v148_v30 = vunpack.c.2.s8 %v128_v13  ;;  %v150_v31 = vunpack.c.3.s8 %v128_v13  ;;  %v130_v39 = vld [vmem:[#allocation4 + $0x18] sm:$0xff] }
  0x1b   :  { %v207_v20 = vcvt.s32.f32 %v143_v14  ;;  %v209_v21 = vcvt.s32.f32 %v145_v15  ;;  %v208_v22 = vcvt.s32.f32 %v144_v16  ;;  %v210_v23 = vcvt.s32.f32 %v146_v17  ;;  %v131_v60 = vld [vmem:[#allocation4 + $0x20] sm:$0xff]  ;;  %v132_v61 = vld [vmem:[#allocation4 + $0x28] sm:$0xff] }
  0x1c   :  { %v211_v32 = vcvt.s32.f32 %v147_v28  ;;  %v213_v33 = vcvt.s32.f32 %v149_v29  ;;  %v212_v34 = vcvt.s32.f32 %v148_v30  ;;  %v214_v35 = vcvt.s32.f32 %v150_v31 }
  0x1d   :  { %470 = vmatpush.bf16.msra.mxu0 %v1448_v4  ;;  %v271_v26 = vpack.c.bf16 %v209_v21, %v207_v20  ;;  %v272_v27 = vpack.c.bf16 %v210_v23, %v208_v22  ;;  %v151_v40 = vunpack.c.0.s8 %v129_v38  ;;  %v153_v41 = vunpack.c.1.s8 %v129_v38  ;;  %v133_v20 = vld [vmem:[#allocation4 + $0x30] sm:$0xff]  ;;  %v134_v21 = vld [vmem:[#allocation4 + $0x38] sm:$0xff]  ;;  %v1464_v22 = vld [vmem:[#allocation9 + $0x28] sm:$0xff] }
  0x1e   :  { %559 = vmatpush.bf16.msra.mxu1 %v1456_v5  ;;  %v273_v36 = vpack.c.bf16 %v213_v33, %v211_v32  ;;  %v274_v37 = vpack.c.bf16 %v214_v35, %v212_v34  ;;  %v152_v42 = vunpack.c.0.s8 %v130_v39  ;;  %v154_v43 = vunpack.c.1.s8 %v130_v39  ;;  %v1462_v32 = vld [vmem:[#allocation9 + $0x18] sm:$0xff]  ;;  %v1461_v35 = vld [vmem:[#allocation9 + $0x10] sm:$0xff] }
  0x1f   :  { %v215_v44 = vcvt.s32.f32 %v151_v40  ;;  %v217_v45 = vcvt.s32.f32 %v153_v41  ;;  %v155_v50 = vunpack.c.2.s8 %v129_v38  ;;  %v157_v51 = vunpack.c.3.s8 %v129_v38  ;;  %v1459_v41 = vld [vmem:[#allocation9] sm:$0xff] }
  0x20   :  { %v216_v46 = vcvt.s32.f32 %v152_v42  ;;  %v218_v47 = vcvt.s32.f32 %v154_v43  ;;  %v156_v52 = vunpack.c.2.s8 %v130_v39  ;;  %v158_v53 = vunpack.c.3.s8 %v130_v39 }
  0x21   :  { %471 = vmatpush.bf16.msra.mxu0 %v1447_v6  ;;  %v275_v48 = vpack.c.bf16 %v217_v45, %v215_v44  ;;  %v219_v54 = vcvt.s32.f32 %v155_v50  ;;  %v221_v55 = vcvt.s32.f32 %v157_v51  ;;  %v159_v62 = vunpack.c.0.s8 %v131_v60 }
  0x22   :  { %560 = vmatpush.bf16.msra.mxu1 %v1455_v7  ;;  %v276_v49 = vpack.c.bf16 %v218_v47, %v216_v46  ;;  %v220_v56 = vcvt.s32.f32 %v156_v52  ;;  %v222_v57 = vcvt.s32.f32 %v158_v53  ;;  %v161_v63 = vunpack.c.1.s8 %v131_v60 }
  0x23   :  { %v277_v58 = vpack.c.bf16 %v221_v55, %v219_v54  ;;  %v160_v0 = vunpack.c.0.s8 %v132_v61  ;;  %v162_v1 = vunpack.c.1.s8 %v132_v61  ;;  %v223_v2 = vcvt.s32.f32 %v159_v62 }
  0x24   :  { %v278_v59 = vpack.c.bf16 %v222_v57, %v220_v56  ;;  %v225_v3 = vcvt.s32.f32 %v161_v63  ;;  %v166_v12 = vunpack.c.3.s8 %v132_v61  ;;  %v167_v23 = vunpack.c.0.s8 %v133_v20 }
  0x25   :  { %472 = vmatpush.bf16.msra.mxu0 %v1446_v8  ;;  %v224_v4 = vcvt.s32.f32 %v160_v0  ;;  %v226_v5 = vcvt.s32.f32 %v162_v1  ;;  %v1466_v8 = vld [vmem:[#allocation9 + $0x38] sm:$0xff]  ;;  %v173_v38 = vunpack.c.3.s8 %v133_v20  ;;  %v172_v39 = vunpack.c.2.s8 %v134_v21 }
  0x26   :  { %561 = vmatpush.bf16.msra.mxu1 %v1454_v9  ;;  %v279_v6 = vpack.c.bf16 %v225_v3, %v223_v2  ;;  %964 = vmatpush.bf16.msra.mxu2 %v1466_v8  ;;  %v163_v9 = vunpack.c.2.s8 %v131_v60  ;;  %v230_v16 = vcvt.s32.f32 %v166_v12  ;;  %v231_v28 = vcvt.s32.f32 %v167_v23 }
  0x27   :  { %v280_v7 = vpack.c.bf16 %v226_v5, %v224_v4  ;;  %v174_v40 = vunpack.c.3.s8 %v134_v21  ;;  %v237_v43 = vcvt.s32.f32 %v173_v38  ;;  %v236_v44 = vcvt.s32.f32 %v172_v39 }
  0x28   :  { %v227_v13 = vcvt.s32.f32 %v163_v9  ;;  %v1761_v0 = vstv %s1872_s0 }
  0x29   :  { %473 = vmatpush.bf16.msra.mxu0 %v1445_v10  ;;  %v165_v10 = vunpack.c.3.s8 %v131_v60  ;;  %v238_v45 = vcvt.s32.f32 %v174_v40 }
  0x2a   :  { %562 = vmatpush.bf16.msra.mxu1 %v1453_v11  ;;  %v164_v11 = vunpack.c.2.s8 %v132_v61 }
  0x2b   :  { %v229_v14 = vcvt.s32.f32 %v165_v10  ;;  %v286_v47 = vpack.c.bf16 %v238_v45, %v236_v44  ;;  %v1540_v45 = vld [vmem:[#allocation7 + $0x10] sm:$0xff]  }
  0x2c   :  { %v228_v15 = vcvt.s32.f32 %v164_v11 }
  0x2d   :  { %474 = vmatpush.bf16.msra.mxu0 %v1444_v18  ;;  %v281_v17 = vpack.c.bf16 %v229_v14, %v227_v13 }
  0x2e   :  { %563 = vmatpush.bf16.msra.mxu1 %v1452_v19  ;;  %v282_v18 = vpack.c.bf16 %v230_v16, %v228_v15  ;;  %v1465_v19 = vld [vmem:[#allocation9 + $0x30] sm:$0xff] }
  0x2f   :  { %965 = vmatpush.bf16.msra.mxu2 %v1465_v19  ;;  %v1539_v19 = vld [vmem:[#allocation7 + $0x8] sm:$0xff]  }
  0x31   :  { %475 = vmatpush.bf16.msra.mxu0 %v1443_v24  ;;  %v169_v24 = vunpack.c.1.s8 %v133_v20 }
  0x32   :  { %564 = vmatpush.bf16.msra.mxu1 %v1451_v25  ;;  %v168_v25 = vunpack.c.0.s8 %v134_v21 }
  0x33   :  { %966 = vmatpush.bf16.msra.mxu2 %v1464_v22  ;;  %v233_v29 = vcvt.s32.f32 %v169_v24  ;;  %v1481_v24 = vunpack.c.l.bf16 %v1539_v19 }
  0x34   :  { %476 = vmatmul.bf16.vlgmr.msra.gmra.mxu0 %v271_v26  ;;  %v170_v26 = vunpack.c.1.s8 %v134_v21  ;;  %v232_v30 = vcvt.s32.f32 %v168_v25  ;;  %v1482_v25 = vunpack.c.h.bf16 %v1539_v19 }
  0x35   :  { %565 = vmatmul.bf16.vlgmr.msra.gmra.mxu1 %v272_v27  ;;  %v1463_v27 = vld [vmem:[#allocation9 + $0x20] sm:$0xff]  ;;  %v283_v33 = vpack.c.bf16 %v233_v29, %v231_v28  ;;  %v818_v28 = vmul.f32 %v1481_v24, %v1761_v0 }
  0x36   :  { %v234_v31 = vcvt.s32.f32 %v170_v26  ;;  %v137_v26 = vld [vmem:[#allocation4 + $0x50] sm:$0xff] }
  0x37   :  { %967 = vmatpush.bf16.msra.mxu2 %v1463_v27  ;;  %v138_v27 = vld [vmem:[#allocation4 + $0x58] sm:$0xff]  ;;  %v183_v29 = vunpack.c.0.s8 %v137_v26 }
  0x38   :  { %v284_v34 = vpack.c.bf16 %v234_v31, %v232_v30  ;;  %v185_v30 = vunpack.c.1.s8 %v137_v26 }
  0x39   :  { %v247_v38 = vcvt.s32.f32 %v183_v29 }
  0x3a   :  { %v249_v39 = vcvt.s32.f32 %v185_v30 }
  0x3b   :  { %968 = vmatpush.bf16.msra.mxu2 %v1462_v32  ;;  %v819_v32 = vmul.f32 %v1482_v25, %v1761_v0 }
  0x3f   :  { %969 = vmatpush.bf16.msra.mxu2 %v1461_v35 }
  0x44   :  { %481 = vmatmul.bf16.gmra.mxu0 %v273_v36  ;;  %v1460_v36 = vld [vmem:[#allocation9 + $0x8] sm:$0xff] }
  0x45   :  { %570 = vmatmul.bf16.gmra.mxu1 %v274_v37  ;;  %v171_v37 = vunpack.c.2.s8 %v133_v20  ;;  %970 = vmatpush.bf16.msra.mxu2 %v1460_v36 }
  0x47   :  { %v235_v42 = vcvt.s32.f32 %v171_v37 }
  0x49   :  { %971 = vmatpush.bf16.msra.mxu2 %v1459_v41  ;;  %v285_v46 = vpack.c.bf16 %v237_v43, %v235_v42 }
  0x54   :  { %486 = vmatmul.bf16.gmra.mxu0 %v275_v48  ;;  %v135_v48 = vld [vmem:[#allocation4 + $0x40] sm:$0xff] }
  0x55   :  { %575 = vmatmul.bf16.gmra.mxu1 %v276_v49  ;;  %v136_v49 = vld [vmem:[#allocation4 + $0x48] sm:$0xff]  ;;  %v175_v50 = vunpack.c.0.s8 %v135_v48  ;;  %v177_v51 = vunpack.c.1.s8 %v135_v48  ;;  %v179_v3 = vunpack.c.2.s8 %v135_v48  ;;  %v181_v4 = vunpack.c.3.s8 %v135_v48 }
  0x56   :  { %v176_v52 = vunpack.c.0.s8 %v136_v49  ;;  %v178_v53 = vunpack.c.1.s8 %v136_v49  ;;  %v182_v8 = vunpack.c.3.s8 %v136_v49 }
  0x57   :  { %v239_v54 = vcvt.s32.f32 %v175_v50  ;;  %v241_v55 = vcvt.s32.f32 %v177_v51  ;;  %v243_v12 = vcvt.s32.f32 %v179_v3  ;;  %v245_v13 = vcvt.s32.f32 %v181_v4 }
  0x58   :  { %v240_v56 = vcvt.s32.f32 %v176_v52  ;;  %v242_v57 = vcvt.s32.f32 %v178_v53  ;;  %v1485_v50 = vunpack.c.l.bf16 %v1540_v45  ;;  %v1486_v51 = vunpack.c.h.bf16 %v1540_v45 }
  0x59   :  { %v289_v20 = vpack.c.bf16 %v245_v13, %v243_v12  ;;  %v187_v53 = vunpack.c.2.s8 %v137_v26  ;;  %v139_v13 = vld [vmem:[#allocation4 + $0x60] sm:$0xff] }
  0x5a   :  { %v288_v60 = vpack.c.bf16 %v242_v57, %v240_v56  ;;  %v820_v52 = vmul.f32 %v1485_v50, %v1761_v0  ;;  %v821_v56 = vmul.f32 %v1486_v51, %v1761_v0  ;;  %v188_v57 = vunpack.c.2.s8 %v138_v27 }
  0x5c   :  { %v252_v3 = vcvt.s32.f32 %v188_v57 }
  0x64   :  { %491 = vmatmul.bf16.gmra.mxu0 %v277_v58  ;;  %v1476_v58 = vld [vmem:[#allocation7] sm:$0xff]  }
  0x65   :  { %580 = vmatmul.bf16.gmra.mxu1 %v278_v59  ;;  %v287_v59 = vpack.c.bf16 %v241_v55, %v239_v54  ;;  %v1477_v63 = vunpack.c.l.bf16 %v1476_v58  ;;  %v1478_v1 = vunpack.c.h.bf16 %v1476_v58  ;;  %v189_v54 = vunpack.c.3.s8 %v137_v26 }
  0x66   :  { %v190_v58 = vunpack.c.3.s8 %v138_v27 }
  0x67   :  { %v816_v2 = vmul.f32 %v1477_v63, %v1761_v0  ;;  %v253_v63 = vcvt.s32.f32 %v189_v54 }
  0x68   :  { %v254_v4 = vcvt.s32.f32 %v190_v58 }
  0x74   :  { %496 = vmatmul.bf16.gmra.mxu0 %v279_v6  ;;  %v817_v6 = vmul.f32 %v1478_v1, %v1761_v0 }
  0x75   :  { %585 = vmatmul.bf16.gmra.mxu1 %v280_v7  ;;  %v180_v7 = vunpack.c.2.s8 %v136_v49 }
  0x77   :  { %v244_v16 = vcvt.s32.f32 %v180_v7 }
  0x84   :  { %501 = vmatmul.bf16.gmra.mxu0 %v281_v17  ;;  %v246_v17 = vcvt.s32.f32 %v182_v8  ;;  %v294_v8 = vpack.c.bf16 %v254_v4, %v252_v3 }
  0x85   :  { %590 = vmatmul.bf16.gmra.mxu1 %v282_v18 }
  0x86   :  { %v290_v21 = vpack.c.bf16 %v246_v17, %v244_v16  ;;  %v191_v16 = vunpack.c.0.s8 %v139_v13  ;;  %v193_v17 = vunpack.c.1.s8 %v139_v13 }
  0x88   :  { %v255_v25 = vcvt.s32.f32 %v191_v16  ;;  %v257_v26 = vcvt.s32.f32 %v193_v17 }
  0x94   :  { %506 = vmatmul.bf16.gmra.mxu0 %v283_v33  ;;  %v184_v33 = vunpack.c.0.s8 %v138_v27 }
  0x95   :  { %595 = vmatmul.bf16.gmra.mxu1 %v284_v34  ;;  %v186_v34 = vunpack.c.1.s8 %v138_v27 }
  0x96   :  { %v248_v42 = vcvt.s32.f32 %v184_v33  ;;  %v295_v33 = vpack.c.bf16 %v257_v26, %v255_v25 }
  0x97   :  { %v250_v43 = vcvt.s32.f32 %v186_v34 }
  0xa4   :  { %511 = vmatmul.bf16.gmra.mxu0 %v285_v46  ;;  %v291_v46 = vpack.c.bf16 %v249_v39, %v247_v38 }
  0xa5   :  { %600 = vmatmul.bf16.gmra.mxu1 %v286_v47  ;;  %v292_v47 = vpack.c.bf16 %v250_v43, %v248_v42 }
  0xb1   :  { %v477_v61 = vpop.f32.mrf.mxu0 }
  0xb2   :  { %v566_v62 = vpop.f32.mrf.mxu1 }
  0xb3   :  { %v567_v5 = vadd.f32 %v566_v62, %v477_v61  ;;  %v251_v62 = vcvt.s32.f32 %v187_v53 }
  0xb4   :  { %516 = vmatmul.bf16.gmra.mxu0 %v287_v59 }
  0xb5   :  { %605 = vmatmul.bf16.gmra.mxu1 %v288_v60  ;;  %v848_v14 = vadd.f32 %v816_v2, %v567_v5  ;;  %v293_v7 = vpack.c.bf16 %v253_v63, %v251_v62  ;;  %v141_v63 = vld [vmem:[#allocation4 + $0x70] sm:$0xff] }
  0xb6   :  { %v199_v3 = vunpack.c.0.s8 %v141_v63  ;;  %v201_v4 = vunpack.c.1.s8 %v141_v63 }
  0xb9   :  { %v479_v9 = vpop.f32.mrf.mxu0 }
  0xba   :  { %v568_v10 = vpop.f32.mrf.mxu1 }
  0xbb   :  { %v569_v11 = vadd.f32 %v568_v10, %v479_v9 }
  0xbd   :  { %v849_v15 = vadd.f32 %v817_v6, %v569_v11  ;;  %v1541_v6 = vld [vmem:[#allocation7 + $0x18] sm:$0xff]  }
  0xbe   :  { %v1489_v11 = vunpack.c.l.bf16 %v1541_v6  ;;  %v1490_v12 = vunpack.c.h.bf16 %v1541_v6 }
  0xbf   :  { %v880_v18 = vpack.c.bf16 %v849_v15, %v848_v14  ;;  %v140_v14 = vld [vmem:[#allocation4 + $0x68] sm:$0xff] }
  0xc0   :  { %v822_v15 = vmul.f32 %v1489_v11, %v1761_v0  ;;  %v823_v19 = vmul.f32 %v1490_v12, %v1761_v0  ;;  %v198_v45 = vunpack.c.3.s8 %v140_v14  ;;  %v263_v12 = vcvt.s32.f32 %v199_v3 }
  0xc1   :  { %972 = vmatmul.bf16.vlgmr.msra.gmra.mxu2 %v880_v18  ;;  %v482_v22 = vpop.f32.mrf.mxu0 }
  0xc2   :  { %v571_v23 = vpop.f32.mrf.mxu1  ;;  %v262_v54 = vcvt.s32.f32 %v198_v45  ;;  %v1471_v45 = vld [vmem:[#allocation10 + $0x20] sm:$0xff] }
  0xc3   :  { %v572_v31 = vadd.f32 %v571_v23, %v482_v22 }
  0xc4   :  { %521 = vmatmul.bf16.gmra.mxu0 %v289_v20  ;;  %v192_v20 = vunpack.c.0.s8 %v140_v14 }
  0xc5   :  { %610 = vmatmul.bf16.gmra.mxu1 %v290_v21  ;;  %v850_v40 = vadd.f32 %v818_v28, %v572_v31  ;;  %v194_v21 = vunpack.c.1.s8 %v140_v14 }
  0xc6   :  { %v256_v29 = vcvt.s32.f32 %v192_v20 }
  0xc7   :  { %v258_v30 = vcvt.s32.f32 %v194_v21 }
  0xc9   :  { %v484_v35 = vpop.f32.mrf.mxu0  ;;  %v296_v34 = vpack.c.bf16 %v258_v30, %v256_v29  ;;  %v203_v29 = vunpack.c.2.s8 %v141_v63  ;;  %v205_v30 = vunpack.c.3.s8 %v141_v63 }
  0xca   :  { %v573_v36 = vpop.f32.mrf.mxu1 }
  0xcb   :  { %v574_v37 = vadd.f32 %v573_v36, %v484_v35 }
  0xcd   :  { %v851_v41 = vadd.f32 %v819_v32, %v574_v37  ;;  %v1542_v32 = vld [vmem:[#allocation7 + $0x20] sm:$0xff]  }
  0xce   :  { %v1493_v37 = vunpack.c.l.bf16 %v1542_v32  ;;  %v1494_v38 = vunpack.c.h.bf16 %v1542_v32 }
  0xcf   :  { %v881_v44 = vpack.c.bf16 %v851_v41, %v850_v40  ;;  %v195_v40 = vunpack.c.2.s8 %v139_v13  ;;  %v197_v41 = vunpack.c.3.s8 %v139_v13  ;;  %v265_v13 = vcvt.s32.f32 %v201_v4 }
  0xd0   :  { %v824_v39 = vmul.f32 %v1493_v37, %v1761_v0  ;;  %v825_v43 = vmul.f32 %v1494_v38, %v1761_v0  ;;  %v1472_v37 = vld [vmem:[#allocation10 + $0x28] sm:$0xff] }
  0xd1   :  { %977 = vmatmul.bf16.gmra.mxu2 %v881_v44  ;;  %v487_v48 = vpop.f32.mrf.mxu0  ;;  %v196_v44 = vunpack.c.2.s8 %v140_v14  ;;  %v261_v50 = vcvt.s32.f32 %v197_v41  ;;  %v299_v20 = vpack.c.bf16 %v265_v13, %v263_v12 }
  0xd2   :  { %v576_v49 = vpop.f32.mrf.mxu1 }
  0xd3   :  { %v577_v55 = vadd.f32 %v576_v49, %v487_v48  ;;  %v259_v49 = vcvt.s32.f32 %v195_v40  ;;  %v260_v53 = vcvt.s32.f32 %v196_v44  ;;  %v269_v40 = vcvt.s32.f32 %v205_v30 }
  0xd4   :  { %526 = vmatmul.bf16.gmra.mxu0 %v291_v46 }
  0xd5   :  { %615 = vmatmul.bf16.gmra.mxu1 %v292_v47  ;;  %v852_v1 = vadd.f32 %v820_v52, %v577_v55  ;;  %v297_v57 = vpack.c.bf16 %v261_v50, %v259_v49  ;;  %v298_v58 = vpack.c.bf16 %v262_v54, %v260_v53 }
  0xd9   :  { %v489_v59 = vpop.f32.mrf.mxu0 }
  0xda   :  { %v578_v60 = vpop.f32.mrf.mxu1 }
  0xdb   :  { %v579_v61 = vadd.f32 %v578_v60, %v489_v59 }
  0xdd   :  { %v853_v2 = vadd.f32 %v821_v56, %v579_v61  ;;  %v1543_v56 = vld [vmem:[#allocation7 + $0x28] sm:$0xff]  }
  0xde   :  { %v1497_v61 = vunpack.c.l.bf16 %v1543_v56  ;;  %v1498_v62 = vunpack.c.h.bf16 %v1543_v56 }
  0xdf   :  { %v882_v5 = vpack.c.bf16 %v853_v2, %v852_v1  ;;  %v142_v1 = vld [vmem:[#allocation4 + $0x78] sm:$0xff] }
  0xe0   :  { %v826_v2 = vmul.f32 %v1497_v61, %v1761_v0  ;;  %v827_v6 = vmul.f32 %v1498_v62, %v1761_v0  ;;  %v1468_v61 = vld [vmem:[#allocation10 + $0x8] sm:$0xff] }
  0xe1   :  { %982 = vmatmul.bf16.gmra.mxu2 %v882_v5  ;;  %v492_v9 = vpop.f32.mrf.mxu0 }
  0xe2   :  { %v581_v10 = vpop.f32.mrf.mxu1 }
  0xe3   :  { %v582_v18 = vadd.f32 %v581_v10, %v492_v9 }
  0xe4   :  { %531 = vmatmul.bf16.gmra.mxu0 %v293_v7  ;;  %v200_v7 = vunpack.c.0.s8 %v142_v1 }
  0xe5   :  { %620 = vmatmul.bf16.gmra.mxu1 %v294_v8  ;;  %v854_v27 = vadd.f32 %v822_v15, %v582_v18  ;;  %v202_v8 = vunpack.c.1.s8 %v142_v1 }
  0xe6   :  { %v264_v16 = vcvt.s32.f32 %v200_v7 }
  0xe7   :  { %v266_v17 = vcvt.s32.f32 %v202_v8 }
  0xe9   :  { %v494_v22 = vpop.f32.mrf.mxu0  ;;  %v300_v21 = vpack.c.bf16 %v266_v17, %v264_v16 }
  0xea   :  { %v583_v23 = vpop.f32.mrf.mxu1 }
  0xeb   :  { %v584_v24 = vadd.f32 %v583_v23, %v494_v22 }
  0xed   :  { %v855_v28 = vadd.f32 %v823_v19, %v584_v24  ;;  %v1544_v19 = vld [vmem:[#allocation7 + $0x30] sm:$0xff]   ;;  %v1474_v24 = vld [vmem:[#allocation10 + $0x38] sm:$0xff] }
  0xee   :  { %v1501_v25 = vunpack.c.l.bf16 %v1544_v19  ;;  %1169 = vmatpush.bf16.msra.mxu3 %v1474_v24  ;;  %v1502_v26 = vunpack.c.h.bf16 %v1544_v19  ;;  %v1784_v24 = vld [vmem:[%s1876_s4] ss:$0 sm:$0xff] }
  0xef   :  { %v883_v31 = vpack.c.bf16 %v855_v28, %v854_v27  ;;  %v1473_v27 = vld [vmem:[#allocation10 + $0x30] sm:$0xff] }
  0xf0   :  { %v828_v28 = vmul.f32 %v1501_v25, %v1761_v0  ;;  %v829_v32 = vmul.f32 %v1502_v26, %v1761_v0 }
  0xf1   :  { %987 = vmatmul.bf16.gmra.mxu2 %v883_v31  ;;  %v497_v35 = vpop.f32.mrf.mxu0 }
  0xf2   :  { %v586_v36 = vpop.f32.mrf.mxu1  ;;  %1170 = vmatpush.bf16.msra.mxu3 %v1473_v27 }
  0xf3   :  { %v587_v42 = vadd.f32 %v586_v36, %v497_v35 }
  0xf4   :  { %536 = vmatmul.bf16.gmra.mxu0 %v295_v33  ;;  %v204_v33 = vunpack.c.2.s8 %v142_v1 }
  0xf5   :  { %625 = vmatmul.bf16.gmra.mxu1 %v296_v34  ;;  %v856_v51 = vadd.f32 %v824_v39, %v587_v42  ;;  %v206_v34 = vunpack.c.3.s8 %v142_v1  ;;  %v267_v39 = vcvt.s32.f32 %v203_v29 }
  0xf6   :  { %1171 = vmatpush.bf16.msra.mxu3 %v1472_v37 }
  0xf7   :  { %v270_v44 = vcvt.s32.f32 %v206_v34 }
  0xf9   :  { %v499_v46 = vpop.f32.mrf.mxu0 }
  0xfa   :  { %v588_v47 = vpop.f32.mrf.mxu1  ;;  %1172 = vmatpush.bf16.msra.mxu3 %v1471_v45 }
  0xfb   :  { %v589_v48 = vadd.f32 %v588_v47, %v499_v46  ;;  %v301_v47 = vpack.c.bf16 %v269_v40, %v267_v39 }
  0xfd   :  { %v857_v52 = vadd.f32 %v825_v43, %v589_v48  ;;  %v268_v43 = vcvt.s32.f32 %v204_v33 }
  0xff   :  { %v884_v55 = vpack.c.bf16 %v857_v52, %v856_v51  ;;  %v302_v48 = vpack.c.bf16 %v270_v44, %v268_v43  ;;  %v1545_v51 = vld [vmem:[#allocation7 + $0x38] sm:$0xff]  }
 0x100   :  { %v1470_v52 = vld [vmem:[#allocation10 + $0x18] sm:$0xff]  ;;  %v1505_v53 = vunpack.c.l.bf16 %v1545_v51  ;;  %v1506_v54 = vunpack.c.h.bf16 %v1545_v51 }
 0x101   :  { %992 = vmatmul.bf16.gmra.mxu2 %v884_v55  ;;  %v502_v59 = vpop.f32.mrf.mxu0  ;;  %1173 = vmatpush.bf16.msra.mxu3 %v1470_v52  ;;  %v1469_v55 = vld [vmem:[#allocation10 + $0x10] sm:$0xff] }
 0x102   :  { %v591_v60 = vpop.f32.mrf.mxu1 }
 0x103   :  { %v592_v5 = vadd.f32 %v591_v60, %v502_v59 }
 0x104   :  { %541 = vmatmul.bf16.gmra.mxu0 %v297_v57  ;;  %v830_v57 = vmul.f32 %v1505_v53, %v1761_v0 }
 0x105   :  { %630 = vmatmul.bf16.gmra.mxu1 %v298_v58  ;;  %v858_v14 = vadd.f32 %v826_v2, %v592_v5  ;;  %1174 = vmatpush.bf16.msra.mxu3 %v1469_v55  ;;  %v831_v58 = vmul.f32 %v1506_v54, %v1761_v0  ;;  %v1467_v2 = vld [vmem:[#allocation10] sm:$0xff] }
 0x109   :  { %v504_v9 = vpop.f32.mrf.mxu0  ;;  %1175 = vmatpush.bf16.msra.mxu3 %v1468_v61 }
 0x10a   :  { %v593_v10 = vpop.f32.mrf.mxu1 }
 0x10b   :  { %v594_v11 = vadd.f32 %v593_v10, %v504_v9 }
 0x10d   :  { %v859_v15 = vadd.f32 %v827_v6, %v594_v11  ;;  %1176 = vmatpush.bf16.msra.mxu3 %v1467_v2  ;;  %v1546_v6 = vld [vmem:[#allocation7 + $0x40] sm:$0xff]  }
 0x10e   :  { %v1509_v7 = vunpack.c.l.bf16 %v1546_v6  ;;  %v1510_v8 = vunpack.c.h.bf16 %v1546_v6 }
 0x10f   :  { %v885_v18 = vpack.c.bf16 %v859_v15, %v858_v14 }
 0x110   :  { %v832_v10 = vmul.f32 %v1509_v7, %v1761_v0  ;;  %v833_v11 = vmul.f32 %v1510_v8, %v1761_v0 }
 0x111   :  { %997 = vmatmul.bf16.gmra.mxu2 %v885_v18  ;;  %v507_v22 = vpop.f32.mrf.mxu0 }
 0x112   :  { %v596_v23 = vpop.f32.mrf.mxu1 }
 0x113   :  { %v597_v31 = vadd.f32 %v596_v23, %v507_v22 }
 0x114   :  { %546 = vmatmul.bf16.gmra.mxu0 %v299_v20  ;;  %v1547_v20 = vld [vmem:[#allocation7 + $0x48] sm:$0xff]  }
 0x115   :  { %635 = vmatmul.bf16.gmra.mxu1 %v300_v21  ;;  %v860_v41 = vadd.f32 %v828_v28, %v597_v31  ;;  %v1513_v22 = vunpack.c.l.bf16 %v1547_v20  ;;  %v1514_v23 = vunpack.c.h.bf16 %v1547_v20 }
 0x117   :  { %v834_v26 = vmul.f32 %v1513_v22, %v1761_v0  ;;  %v835_v27 = vmul.f32 %v1514_v23, %v1761_v0 }
 0x119   :  { %v509_v35 = vpop.f32.mrf.mxu0 }
 0x11a   :  { %v598_v36 = vpop.f32.mrf.mxu1 }
 0x11b   :  { %v599_v38 = vadd.f32 %v598_v36, %v509_v35 }
 0x11d   :  { %v861_v42 = vadd.f32 %v829_v32, %v599_v38 }
 0x11f   :  { %v886_v46 = vpack.c.bf16 %v861_v42, %v860_v41  ;;  %v1548_v42 = vld [vmem:[#allocation7 + $0x50] sm:$0xff]  }
 0x120   :  { %v1517_v44 = vunpack.c.l.bf16 %v1548_v42  ;;  %v1518_v45 = vunpack.c.h.bf16 %v1548_v42 }
 0x121   :  { %1002 = vmatmul.bf16.gmra.mxu2 %v886_v46  ;;  %v512_v49 = vpop.f32.mrf.mxu0 }
 0x122   :  { %v601_v50 = vpop.f32.mrf.mxu1 }
 0x123   :  { %v602_v56 = vadd.f32 %v601_v50, %v512_v49 }
 0x124   :  { %551 = vmatmul.bf16.gmra.mxu0 %v301_v47  ;;  %v836_v47 = vmul.f32 %v1517_v44, %v1761_v0 }
 0x125   :  { %640 = vmatmul.bf16.gmra.mxu1 %v302_v48  ;;  %v862_v63 = vadd.f32 %v830_v57, %v602_v56  ;;  %v837_v48 = vmul.f32 %v1518_v45, %v1761_v0 }
 0x129   :  { %v514_v59 = vpop.f32.mrf.mxu0 }
 0x12a   :  { %v603_v60 = vpop.f32.mrf.mxu1 }
 0x12b   :  { %v604_v62 = vadd.f32 %v603_v60, %v514_v59 }
 0x12d   :  { %v863_v1 = vadd.f32 %v831_v58, %v604_v62 }
 0x12f   :  { %v887_v3 = vpack.c.bf16 %v863_v1, %v862_v63  ;;  %v1549_v63 = vld [vmem:[#allocation7 + $0x58] sm:$0xff]  }
 0x130   :  { %v1521_v2 = vunpack.c.l.bf16 %v1549_v63 }
 0x131   :  { %1007 = vmatmul.bf16.gmra.mxu2 %v887_v3  ;;  %v517_v4 = vpop.f32.mrf.mxu0  ;;  %v1522_v3 = vunpack.c.h.bf16 %v1549_v63 }
 0x132   :  { %v606_v5 = vpop.f32.mrf.mxu1 }
 0x133   :  { %v607_v9 = vadd.f32 %v606_v5, %v517_v4  ;;  %v838_v5 = vmul.f32 %v1521_v2, %v1761_v0  ;;  %v839_v6 = vmul.f32 %v1522_v3, %v1761_v0 }
 0x135   :  { %v864_v15 = vadd.f32 %v832_v10, %v607_v9 }
 0x139   :  { %v519_v12 = vpop.f32.mrf.mxu0 }
 0x13a   :  { %v608_v13 = vpop.f32.mrf.mxu1 }
 0x13b   :  { %v609_v14 = vadd.f32 %v608_v13, %v519_v12 }
 0x13d   :  { %v865_v16 = vadd.f32 %v833_v11, %v609_v14 }
 0x13f   :  { %v888_v17 = vpack.c.bf16 %v865_v16, %v864_v15 }
 0x141   :  { %1012 = vmatmul.bf16.gmra.mxu2 %v888_v17  ;;  %v522_v18 = vpop.f32.mrf.mxu0 }
 0x142   :  { %v611_v19 = vpop.f32.mrf.mxu1 }
 0x143   :  { %v612_v25 = vadd.f32 %v611_v19, %v522_v18 }
 0x144   :  { %v973_v21 = vpop.f32.mrf.mxu2 }
 0x145   :  { %v974_v30 = vadd.f32 %v1784_v24, %v973_v21  ;;  %v866_v33 = vadd.f32 %v834_v26, %v612_v25  ;;  %v1550_v21 = vld [vmem:[#allocation7 + $0x60] sm:$0xff]  }
 0x146   :  { %v1525_v23 = vunpack.c.l.bf16 %v1550_v21  ;;  %v1526_v25 = vunpack.c.h.bf16 %v1550_v21 }
 0x147   :  { %v1053_v36 = vmax.f32 %v974_v30, 0.0 }
 0x149   :  { %v524_v28 = vpop.f32.mrf.mxu0 }
 0x14a   :  { %v613_v29 = vpop.f32.mrf.mxu1 }
 0x14b   :  { %v614_v31 = vadd.f32 %v613_v29, %v524_v28  ;;  %v841_v28 = vmul.f32 %v1526_v25, %v1761_v0 }
 0x14c   :  { %v975_v32 = vpop.f32.mrf.mxu2 }
 0x14d   :  { %v867_v34 = vadd.f32 %v835_v27, %v614_v31  ;;  %v976_v35 = vadd.f32 %v1784_v24, %v975_v32  ;;  %v840_v27 = vmul.f32 %v1525_v23, %v1761_v0 }
 0x14f   :  { %v1054_v37 = vmax.f32 %v976_v35, 0.0  ;;  %v889_v38 = vpack.c.bf16 %v867_v34, %v866_v33 }
 0x151   :  { %1017 = vmatmul.bf16.gmra.mxu2 %v889_v38  ;;  %v1085_v39 = vpack.c.bf16 %v1054_v37, %v1053_v36  ;;  %v527_v40 = vpop.f32.mrf.mxu0 }
 0x152   :  { %v616_v41 = vpop.f32.mrf.mxu1 }
 0x153   :  { %1177 = vmatmul.bf16.vlgmr.msra.gmra.mxu3 %v1085_v39  ;;  %v617_v46 = vadd.f32 %v616_v41, %v527_v40 }
 0x154   :  { %v978_v43 = vpop.f32.mrf.mxu2 }
 0x155   :  { %v979_v51 = vadd.f32 %v1784_v24, %v978_v43  ;;  %v868_v54 = vadd.f32 %v836_v47, %v617_v46  ;;  %v1551_v43 = vld [vmem:[#allocation7 + $0x68] sm:$0xff]  }
 0x156   :  { %v1529_v45 = vunpack.c.l.bf16 %v1551_v43  ;;  %v1530_v46 = vunpack.c.h.bf16 %v1551_v43 }
 0x157   :  { %v1055_v57 = vmax.f32 %v979_v51, 0.0 }
 0x159   :  { %v529_v49 = vpop.f32.mrf.mxu0 }
 0x15a   :  { %v618_v50 = vpop.f32.mrf.mxu1 }
 0x15b   :  { %v619_v52 = vadd.f32 %v618_v50, %v529_v49  ;;  %v843_v49 = vmul.f32 %v1530_v46, %v1761_v0 }
 0x15c   :  { %v980_v53 = vpop.f32.mrf.mxu2 }
 0x15d   :  { %v869_v55 = vadd.f32 %v837_v48, %v619_v52  ;;  %v981_v56 = vadd.f32 %v1784_v24, %v980_v53  ;;  %v842_v48 = vmul.f32 %v1529_v45, %v1761_v0 }
 0x15f   :  { %v1056_v58 = vmax.f32 %v981_v56, 0.0  ;;  %v890_v59 = vpack.c.bf16 %v869_v55, %v868_v54 }
 0x161   :  { %1022 = vmatmul.bf16.gmra.mxu2 %v890_v59  ;;  %v1086_v60 = vpack.c.bf16 %v1056_v58, %v1055_v57  ;;  %v532_v61 = vpop.f32.mrf.mxu0 }
 0x162   :  { %v621_v62 = vpop.f32.mrf.mxu1 }
 0x163   :  { %1182 = vmatmul.bf16.gmra.mxu3 %v1086_v60  ;;  %v622_v4 = vadd.f32 %v621_v62, %v532_v61 }
 0x164   :  { %v983_v1 = vpop.f32.mrf.mxu2 }
 0x165   :  { %v984_v9 = vadd.f32 %v1784_v24, %v983_v1  ;;  %v870_v12 = vadd.f32 %v838_v5, %v622_v4  ;;  %v1552_v1 = vld [vmem:[#allocation7 + $0x70] sm:$0xff]  }
 0x166   :  { %v1533_v3 = vunpack.c.l.bf16 %v1552_v1  ;;  %v1534_v4 = vunpack.c.h.bf16 %v1552_v1 }
 0x167   :  { %v1057_v15 = vmax.f32 %v984_v9, 0.0 }
 0x169   :  { %v534_v7 = vpop.f32.mrf.mxu0 }
 0x16a   :  { %v623_v8 = vpop.f32.mrf.mxu1 }
 0x16b   :  { %v624_v10 = vadd.f32 %v623_v8, %v534_v7  ;;  %v845_v7 = vmul.f32 %v1534_v4, %v1761_v0 }
 0x16c   :  { %v985_v11 = vpop.f32.mrf.mxu2 }
 0x16d   :  { %v871_v13 = vadd.f32 %v839_v6, %v624_v10  ;;  %v986_v14 = vadd.f32 %v1784_v24, %v985_v11  ;;  %v844_v6 = vmul.f32 %v1533_v3, %v1761_v0 }
 0x16f   :  { %v1058_v16 = vmax.f32 %v986_v14, 0.0  ;;  %v891_v17 = vpack.c.bf16 %v871_v13, %v870_v12 }
 0x171   :  { %1027 = vmatmul.bf16.gmra.mxu2 %v891_v17  ;;  %v1087_v18 = vpack.c.bf16 %v1058_v16, %v1057_v15  ;;  %v537_v19 = vpop.f32.mrf.mxu0 }
 0x172   :  { %v626_v20 = vpop.f32.mrf.mxu1 }
 0x173   :  { %1187 = vmatmul.bf16.gmra.mxu3 %v1087_v18  ;;  %v627_v26 = vadd.f32 %v626_v20, %v537_v19 }
 0x174   :  { %v988_v22 = vpop.f32.mrf.mxu2 }
 0x175   :  { %v989_v31 = vadd.f32 %v1784_v24, %v988_v22  ;;  %v872_v34 = vadd.f32 %v840_v27, %v627_v26  ;;  %v1553_v22 = vld [vmem:[#allocation7 + $0x78] sm:$0xff]  }
 0x176   :  { %v1537_v25 = vunpack.c.l.bf16 %v1553_v22  ;;  %v1538_v26 = vunpack.c.h.bf16 %v1553_v22 }
 0x177   :  { %v1059_v37 = vmax.f32 %v989_v31, 0.0 }
 0x179   :  { %v539_v29 = vpop.f32.mrf.mxu0 }
 0x17a   :  { %v628_v30 = vpop.f32.mrf.mxu1 }
 0x17b   :  { %v629_v32 = vadd.f32 %v628_v30, %v539_v29  ;;  %v847_v29 = vmul.f32 %v1538_v26, %v1761_v0 }
 0x17c   :  { %v990_v33 = vpop.f32.mrf.mxu2 }
 0x17d   :  { %v873_v35 = vadd.f32 %v841_v28, %v629_v32  ;;  %v991_v36 = vadd.f32 %v1784_v24, %v990_v33  ;;  %v846_v28 = vmul.f32 %v1537_v25, %v1761_v0 }
 0x17f   :  { %v1060_v38 = vmax.f32 %v991_v36, 0.0  ;;  %v892_v39 = vpack.c.bf16 %v873_v35, %v872_v34 }
 0x181   :  { %1032 = vmatmul.bf16.gmra.mxu2 %v892_v39  ;;  %v1088_v40 = vpack.c.bf16 %v1060_v38, %v1059_v37  ;;  %v542_v41 = vpop.f32.mrf.mxu0 }
 0x182   :  { %v631_v42 = vpop.f32.mrf.mxu1 }
 0x183   :  { %1192 = vmatmul.bf16.gmra.mxu3 %v1088_v40  ;;  %v632_v47 = vadd.f32 %v631_v42, %v542_v41 }
 0x184   :  { %v993_v44 = vpop.f32.mrf.mxu2 }
 0x185   :  { %v994_v52 = vadd.f32 %v1784_v24, %v993_v44  ;;  %v874_v55 = vadd.f32 %v842_v48, %v632_v47 }
 0x187   :  { %v1061_v58 = vmax.f32 %v994_v52, 0.0 }
 0x189   :  { %v544_v50 = vpop.f32.mrf.mxu0 }
 0x18a   :  { %v633_v51 = vpop.f32.mrf.mxu1 }
 0x18b   :  { %v634_v53 = vadd.f32 %v633_v51, %v544_v50 }
 0x18c   :  { %v995_v54 = vpop.f32.mrf.mxu2 }
 0x18d   :  { %v875_v56 = vadd.f32 %v843_v49, %v634_v53  ;;  %v996_v57 = vadd.f32 %v1784_v24, %v995_v54 }
 0x18f   :  { %v1062_v59 = vmax.f32 %v996_v57, 0.0  ;;  %v893_v60 = vpack.c.bf16 %v875_v56, %v874_v55  ;;  %v1821_v55 = vld [vmem:[%s1878_s6] ss:$0 sm:$0xff]  ;;  %s1703_s6 = smov [#allocation12]  }
 0x190   :  { %s1294_s25 = sshll.u32 %s1703_s6, 4  ;;  %s1295_s25 = int_to_ptr.vmem [resolvable:$true] %s1294_s25 }
 0x191   :  { %1037 = vmatmul.bf16.gmra.mxu2 %v893_v60  ;;  %v1089_v61 = vpack.c.bf16 %v1062_v59, %v1061_v58  ;;  %v547_v62 = vpop.f32.mrf.mxu0 }
 0x192   :  { %v636_v63 = vpop.f32.mrf.mxu1 }
 0x193   :  { %1197 = vmatmul.bf16.gmra.mxu3 %v1089_v61  ;;  %v637_v5 = vadd.f32 %v636_v63, %v547_v62 }
 0x194   :  { %v998_v2 = vpop.f32.mrf.mxu2 }
 0x195   :  { %v999_v10 = vadd.f32 %v1784_v24, %v998_v2  ;;  %v876_v13 = vadd.f32 %v844_v6, %v637_v5 }
 0x197   :  { %v1063_v16 = vmax.f32 %v999_v10, 0.0 }
 0x199   :  { %v549_v8 = vpop.f32.mrf.mxu0 }
 0x19a   :  { %v638_v9 = vpop.f32.mrf.mxu1 }
 0x19b   :  { %v639_v11 = vadd.f32 %v638_v9, %v549_v8 }
 0x19c   :  { %v1000_v12 = vpop.f32.mrf.mxu2 }
 0x19d   :  { %v877_v14 = vadd.f32 %v845_v7, %v639_v11  ;;  %v1001_v15 = vadd.f32 %v1784_v24, %v1000_v12 }
 0x19f   :  { %v1064_v17 = vmax.f32 %v1001_v15, 0.0  ;;  %v894_v18 = vpack.c.bf16 %v877_v14, %v876_v13 }
 0x1a1   :  { %1042 = vmatmul.bf16.gmra.mxu2 %v894_v18  ;;  %v1090_v19 = vpack.c.bf16 %v1064_v17, %v1063_v16  ;;  %v552_v20 = vpop.f32.mrf.mxu0 }
 0x1a2   :  { %v641_v21 = vpop.f32.mrf.mxu1 }
 0x1a3   :  { %1202 = vmatmul.bf16.gmra.mxu3 %v1090_v19  ;;  %v642_v27 = vadd.f32 %v641_v21, %v552_v20 }
 0x1a4   :  { %v1003_v23 = vpop.f32.mrf.mxu2 }
 0x1a5   :  { %v1004_v32 = vadd.f32 %v1784_v24, %v1003_v23  ;;  %v878_v35 = vadd.f32 %v846_v28, %v642_v27 }
 0x1a7   :  { %v1065_v38 = vmax.f32 %v1004_v32, 0.0 }
 0x1a9   :  { %v554_v30 = vpop.f32.mrf.mxu0 }
 0x1aa   :  { %v643_v31 = vpop.f32.mrf.mxu1 }
 0x1ab   :  { %v644_v33 = vadd.f32 %v643_v31, %v554_v30 }
 0x1ac   :  { %v1005_v34 = vpop.f32.mrf.mxu2 }
 0x1ad   :  { %v879_v36 = vadd.f32 %v847_v29, %v644_v33  ;;  %v1006_v37 = vadd.f32 %v1784_v24, %v1005_v34 }
 0x1af   :  { %v1066_v39 = vmax.f32 %v1006_v37, 0.0  ;;  %v895_v40 = vpack.c.bf16 %v879_v36, %v878_v35 }
 0x1b1   :  { %1047 = vmatmul.bf16.gmra.mxu2 %v895_v40  ;;  %v1091_v41 = vpack.c.bf16 %v1066_v39, %v1065_v38 }
 0x1b3   :  { %1207 = vmatmul.bf16.gmra.mxu3 %v1091_v41 }
 0x1b4   :  { %v1008_v42 = vpop.f32.mrf.mxu2 }
 0x1b5   :  { %v1009_v43 = vadd.f32 %v1784_v24, %v1008_v42 }
 0x1b7   :  { %v1067_v45 = vmax.f32 %v1009_v43, 0.0 }
 0x1bc   :  { %v1010_v0 = vpop.f32.mrf.mxu2 }
 0x1bd   :  { %v1011_v44 = vadd.f32 %v1784_v24, %v1010_v0 }
 0x1bf   :  { %v1068_v46 = vmax.f32 %v1011_v44, 0.0 }
 0x1c1   :  { %v1092_v47 = vpack.c.bf16 %v1068_v46, %v1067_v45 }
 0x1c3   :  { %1212 = vmatmul.bf16.gmra.mxu3 %v1092_v47 }
 0x1c4   :  { %v1013_v48 = vpop.f32.mrf.mxu2 }
 0x1c5   :  { %v1014_v49 = vadd.f32 %v1784_v24, %v1013_v48 }
 0x1c7   :  { %v1069_v52 = vmax.f32 %v1014_v49, 0.0 }
 0x1cc   :  { %v1015_v50 = vpop.f32.mrf.mxu2 }
 0x1cd   :  { %v1016_v51 = vadd.f32 %v1784_v24, %v1015_v50 }
 0x1cf   :  { %v1070_v53 = vmax.f32 %v1016_v51, 0.0 }
 0x1d1   :  { %v1093_v54 = vpack.c.bf16 %v1070_v53, %v1069_v52 }
 0x1d3   :  { %1217 = vmatmul.bf16.gmra.mxu3 %v1093_v54 }
 0x1d4   :  { %v1018_v56 = vpop.f32.mrf.mxu2 }
 0x1d5   :  { %v1019_v59 = vadd.f32 %v1784_v24, %v1018_v56 }
 0x1d6   :  { %v1178_v57 = vpop.f32.mrf.mxu3 }
 0x1d7   :  { %v1179_v58 = vadd.f32 %v1821_v55, %v1178_v57  ;;  %v1071_v63 = vmax.f32 %v1019_v59, 0.0 }
 0x1d9   :  { %1258 = vst [vmem:[#allocation12] sm:$0xff] %v1179_v58 }
 0x1dc   :  { %v1020_v60 = vpop.f32.mrf.mxu2 }
 0x1dd   :  { %v1021_v61 = vadd.f32 %v1784_v24, %v1020_v60 }
 0x1de   :  { %v1180_v62 = vpop.f32.mrf.mxu3 }
 0x1df   :  { %v1072_v1 = vmax.f32 %v1021_v61, 0.0  ;;  %v1181_v2 = vadd.f32 %v1821_v55, %v1180_v62 }
 0x1e1   :  { %1259 = vst [vmem:[#allocation12 + $0x8] sm:$0xff] %v1181_v2  ;;  %v1094_v3 = vpack.c.bf16 %v1072_v1, %v1071_v63 }
 0x1e3   :  { %1222 = vmatmul.bf16.gmra.mxu3 %v1094_v3 }
 0x1e4   :  { %v1023_v4 = vpop.f32.mrf.mxu2 }
 0x1e5   :  { %v1024_v7 = vadd.f32 %v1784_v24, %v1023_v4 }
 0x1e6   :  { %v1183_v5 = vpop.f32.mrf.mxu3 }
 0x1e7   :  { %v1184_v6 = vadd.f32 %v1821_v55, %v1183_v5  ;;  %v1073_v11 = vmax.f32 %v1024_v7, 0.0 }
 0x1e9   :  { %1260 = vst [vmem:[#allocation12 + $0x10] sm:$0xff] %v1184_v6 }
 0x1ec   :  { %v1025_v8 = vpop.f32.mrf.mxu2 }
 0x1ed   :  { %v1026_v9 = vadd.f32 %v1784_v24, %v1025_v8 }
 0x1ee   :  { %v1185_v10 = vpop.f32.mrf.mxu3 }
 0x1ef   :  { %v1074_v12 = vmax.f32 %v1026_v9, 0.0  ;;  %v1186_v13 = vadd.f32 %v1821_v55, %v1185_v10 }
 0x1f1   :  { %1261 = vst [vmem:[#allocation12 + $0x18] sm:$0xff] %v1186_v13  ;;  %v1095_v14 = vpack.c.bf16 %v1074_v12, %v1073_v11 }
 0x1f3   :  { %1227 = vmatmul.bf16.gmra.mxu3 %v1095_v14 }
 0x1f4   :  { %v1028_v15 = vpop.f32.mrf.mxu2 }
 0x1f5   :  { %v1029_v18 = vadd.f32 %v1784_v24, %v1028_v15 }
 0x1f6   :  { %v1188_v16 = vpop.f32.mrf.mxu3 }
 0x1f7   :  { %v1189_v17 = vadd.f32 %v1821_v55, %v1188_v16  ;;  %v1075_v22 = vmax.f32 %v1029_v18, 0.0 }
 0x1f9   :  { %1262 = vst [vmem:[#allocation12 + $0x20] sm:$0xff] %v1189_v17 }
 0x1fc   :  { %v1030_v19 = vpop.f32.mrf.mxu2 }
 0x1fd   :  { %v1031_v20 = vadd.f32 %v1784_v24, %v1030_v19 }
 0x1fe   :  { %v1190_v21 = vpop.f32.mrf.mxu3 }
 0x1ff   :  { %v1076_v23 = vmax.f32 %v1031_v20, 0.0  ;;  %v1191_v25 = vadd.f32 %v1821_v55, %v1190_v21 }
 0x201   :  { %1263 = vst [vmem:[#allocation12 + $0x28] sm:$0xff] %v1191_v25  ;;  %v1096_v26 = vpack.c.bf16 %v1076_v23, %v1075_v22 }
 0x203   :  { %1232 = vmatmul.bf16.gmra.mxu3 %v1096_v26 }
 0x204   :  { %v1033_v27 = vpop.f32.mrf.mxu2 }
 0x205   :  { %v1034_v30 = vadd.f32 %v1784_v24, %v1033_v27 }
 0x206   :  { %v1193_v28 = vpop.f32.mrf.mxu3 }
 0x207   :  { %v1194_v29 = vadd.f32 %v1821_v55, %v1193_v28  ;;  %v1077_v34 = vmax.f32 %v1034_v30, 0.0 }
 0x209   :  { %1264 = vst [vmem:[#allocation12 + $0x30] sm:$0xff] %v1194_v29 }
 0x20c   :  { %v1035_v31 = vpop.f32.mrf.mxu2 }
 0x20d   :  { %v1036_v32 = vadd.f32 %v1784_v24, %v1035_v31 }
 0x20e   :  { %v1195_v33 = vpop.f32.mrf.mxu3 }
 0x20f   :  { %v1078_v35 = vmax.f32 %v1036_v32, 0.0  ;;  %v1196_v36 = vadd.f32 %v1821_v55, %v1195_v33 }
 0x211   :  { %v1097_v37 = vpack.c.bf16 %v1078_v35, %v1077_v34  ;;  %1265 = vst [vmem:[#allocation12 + $0x38] sm:$0xff] %v1196_v36 }
 0x213   :  { %1237 = vmatmul.bf16.gmra.mxu3 %v1097_v37 }
 0x214   :  { %v1038_v38 = vpop.f32.mrf.mxu2 }
 0x215   :  { %v1039_v41 = vadd.f32 %v1784_v24, %v1038_v38 }
 0x216   :  { %v1198_v39 = vpop.f32.mrf.mxu3 }
 0x217   :  { %v1199_v40 = vadd.f32 %v1821_v55, %v1198_v39  ;;  %v1079_v44 = vmax.f32 %v1039_v41, 0.0 }
 0x219   :  { %1266 = vst [vmem:[#allocation12 + $0x40] sm:$0xff] %v1199_v40 }
 0x21c   :  { %v1040_v42 = vpop.f32.mrf.mxu2 }
 0x21d   :  { %v1041_v43 = vadd.f32 %v1784_v24, %v1040_v42 }
 0x21e   :  { %v1200_v0 = vpop.f32.mrf.mxu3 }
 0x21f   :  { %v1080_v45 = vmax.f32 %v1041_v43, 0.0  ;;  %v1201_v46 = vadd.f32 %v1821_v55, %v1200_v0 }
 0x221   :  { %v1098_v47 = vpack.c.bf16 %v1080_v45, %v1079_v44  ;;  %1267 = vst [vmem:[#allocation12 + $0x48] sm:$0xff] %v1201_v46 }
 0x223   :  { %1242 = vmatmul.bf16.gmra.mxu3 %v1098_v47 }
 0x224   :  { %v1043_v48 = vpop.f32.mrf.mxu2 }
 0x225   :  { %v1044_v51 = vadd.f32 %v1784_v24, %v1043_v48 }
 0x226   :  { %v1203_v49 = vpop.f32.mrf.mxu3 }
 0x227   :  { %v1204_v50 = vadd.f32 %v1821_v55, %v1203_v49  ;;  %v1081_v56 = vmax.f32 %v1044_v51, 0.0 }
 0x229   :  { %1268 = vst [vmem:[#allocation12 + $0x50] sm:$0xff] %v1204_v50 }
 0x22c   :  { %v1045_v52 = vpop.f32.mrf.mxu2 }
 0x22d   :  { %v1046_v53 = vadd.f32 %v1784_v24, %v1045_v52 }
 0x22e   :  { %v1205_v54 = vpop.f32.mrf.mxu3 }
 0x22f   :  { %v1082_v57 = vmax.f32 %v1046_v53, 0.0  ;;  %v1206_v58 = vadd.f32 %v1821_v55, %v1205_v54 }
 0x231   :  { %v1099_v59 = vpack.c.bf16 %v1082_v57, %v1081_v56  ;;  %1269 = vst [vmem:[#allocation12 + $0x58] sm:$0xff] %v1206_v58 }
 0x233   :  { %1247 = vmatmul.bf16.gmra.mxu3 %v1099_v59 }
 0x234   :  { %v1048_v60 = vpop.f32.mrf.mxu2 }
 0x235   :  { %v1049_v63 = vadd.f32 %v1784_v24, %v1048_v60 }
 0x236   :  { %v1208_v61 = vpop.f32.mrf.mxu3 }
 0x237   :  { %v1209_v62 = vadd.f32 %v1821_v55, %v1208_v61  ;;  %v1083_v4 = vmax.f32 %v1049_v63, 0.0 }
 0x239   :  { %1270 = vst [vmem:[#allocation12 + $0x60] sm:$0xff] %v1209_v62 }
 0x23c   :  { %v1050_v1 = vpop.f32.mrf.mxu2 }
 0x23d   :  { %v1051_v2 = vadd.f32 %v1784_v24, %v1050_v1 }
 0x23e   :  { %v1210_v3 = vpop.f32.mrf.mxu3 }
 0x23f   :  { %v1084_v5 = vmax.f32 %v1051_v2, 0.0  ;;  %v1211_v6 = vadd.f32 %v1821_v55, %v1210_v3 }
 0x241   :  { %v1100_v7 = vpack.c.bf16 %v1084_v5, %v1083_v4  ;;  %1271 = vst [vmem:[#allocation12 + $0x68] sm:$0xff] %v1211_v6 }
 0x243   :  { %1252 = vmatmul.bf16.gmra.mxu3 %v1100_v7 }
 0x246   :  { %v1213_v8 = vpop.f32.mrf.mxu3 }
 0x247   :  { %v1214_v9 = vadd.f32 %v1821_v55, %v1213_v8 }
 0x249   :  { %1272 = vst [vmem:[#allocation12 + $0x70] sm:$0xff] %v1214_v9 }
 0x24e   :  { %v1215_v10 = vpop.f32.mrf.mxu3 }
 0x24f   :  { %v1216_v11 = vadd.f32 %v1821_v55, %v1215_v10 }
 0x251   :  { %1273 = vst [vmem:[#allocation12 + $0x78] sm:$0xff] %v1216_v11 }
 0x256   :  { %v1218_v12 = vpop.f32.mrf.mxu3 }
 0x257   :  { %v1219_v13 = vadd.f32 %v1821_v55, %v1218_v12 }
 0x259   :  { %1274 = vst [vmem:[#allocation12 + $0x80] sm:$0xff] %v1219_v13 }
 0x25e   :  { %v1220_v24 = vpop.f32.mrf.mxu3 }
 0x25f   :  { %v1221_v14 = vadd.f32 %v1821_v55, %v1220_v24 }
 0x261   :  { %1275 = vst [vmem:[#allocation12 + $0x88] sm:$0xff] %v1221_v14 }
 0x266   :  { %v1223_v15 = vpop.f32.mrf.mxu3 }
 0x267   :  { %v1224_v16 = vadd.f32 %v1821_v55, %v1223_v15 }
 0x269   :  { %1276 = vst [vmem:[#allocation12 + $0x90] sm:$0xff] %v1224_v16 }
 0x26e   :  { %v1225_v17 = vpop.f32.mrf.mxu3 }
 0x26f   :  { %v1226_v18 = vadd.f32 %v1821_v55, %v1225_v17 }
 0x271   :  { %1277 = vst [vmem:[#allocation12 + $0x98] sm:$0xff] %v1226_v18 }
 0x276   :  { %v1228_v19 = vpop.f32.mrf.mxu3 }
 0x277   :  { %v1229_v20 = vadd.f32 %v1821_v55, %v1228_v19 }
 0x279   :  { %1278 = vst [vmem:[#allocation12 + $0xa0] sm:$0xff] %v1229_v20 }
 0x27e   :  { %v1230_v21 = vpop.f32.mrf.mxu3 }
 0x27f   :  { %v1231_v22 = vadd.f32 %v1821_v55, %v1230_v21 }
 0x281   :  { %1279 = vst [vmem:[#allocation12 + $0xa8] sm:$0xff] %v1231_v22 }
 0x286   :  { %v1233_v23 = vpop.f32.mrf.mxu3 }
 0x287   :  { %v1234_v25 = vadd.f32 %v1821_v55, %v1233_v23 }
 0x289   :  { %1280 = vst [vmem:[#allocation12 + $0xb0] sm:$0xff] %v1234_v25 }
 0x28e   :  { %v1235_v26 = vpop.f32.mrf.mxu3 }
 0x28f   :  { %v1236_v27 = vadd.f32 %v1821_v55, %v1235_v26 }
 0x291   :  { %1281 = vst [vmem:[#allocation12 + $0xb8] sm:$0xff] %v1236_v27 }
 0x296   :  { %v1238_v28 = vpop.f32.mrf.mxu3 }
 0x297   :  { %v1239_v29 = vadd.f32 %v1821_v55, %v1238_v28 }
 0x299   :  { %1282 = vst [vmem:[#allocation12 + $0xc0] sm:$0xff] %v1239_v29 }
 0x29e   :  { %v1240_v30 = vpop.f32.mrf.mxu3 }
 0x29f   :  { %v1241_v31 = vadd.f32 %v1821_v55, %v1240_v30 }
 0x2a1   :  { %1283 = vst [vmem:[#allocation12 + $0xc8] sm:$0xff] %v1241_v31 }
 0x2a6   :  { %v1243_v32 = vpop.f32.mrf.mxu3 }
 0x2a7   :  { %v1244_v33 = vadd.f32 %v1821_v55, %v1243_v32 }
 0x2a9   :  { %1284 = vst [vmem:[#allocation12 + $0xd0] sm:$0xff] %v1244_v33 }
 0x2ae   :  { %v1245_v34 = vpop.f32.mrf.mxu3 }
 0x2af   :  { %v1246_v35 = vadd.f32 %v1821_v55, %v1245_v34 }
 0x2b1   :  { %1285 = vst [vmem:[#allocation12 + $0xd8] sm:$0xff] %v1246_v35 }
 0x2b6   :  { %v1248_v36 = vpop.f32.mrf.mxu3 }
 0x2b7   :  { %v1249_v37 = vadd.f32 %v1821_v55, %v1248_v36 }
 0x2b9   :  { %1286 = vst [vmem:[#allocation12 + $0xe0] sm:$0xff] %v1249_v37 }
 0x2be   :  { %v1250_v38 = vpop.f32.mrf.mxu3 }
 0x2bf   :  { %v1251_v39 = vadd.f32 %v1821_v55, %v1250_v38 }
 0x2c1   :  { %1287 = vst [vmem:[#allocation12 + $0xe8] sm:$0xff] %v1251_v39 }
 0x2c6   :  { %v1253_v40 = vpop.f32.mrf.mxu3 }
 0x2c7   :  { %v1254_v41 = vadd.f32 %v1821_v55, %v1253_v40 }
 0x2c9   :  { %1288 = vst [vmem:[#allocation12 + $0xf0] sm:$0xff] %v1254_v41 }
 0x2ce   :  { %v1255_v42 = vpop.f32.mrf.mxu3 }
 0x2cf   :  { %v1256_v43 = vadd.f32 %v1821_v55, %v1255_v42 }
 0x2d1   :  { %1289 = vst [vmem:[#allocation12 + $0xf8] sm:$0xff] %v1256_v43 }
 0x2d2   :  { %1302 = dma.vmem_to_hbm [thread:$0]  %s1295_s25, 4096, %s1297_s28, [#allocation6], %s1704_s29, %s1704_s29, %s1705_s30  }
 0x2d3   :  { %1693 = dma.done.wait [#allocation6], 4096  }
 0x2d4   :  { %1694 = vsyncadd [#allocation6], 4294963200 }
 0x2d5   :  { %1307 = vsyncpa [#allocation5], 1 }
 0x2d6   :  { %1308 = vsyncpa [#allocation8], 1 }
 0x2d7   :  { %1309 = vsyncpa [#allocation11], 1 }
 0x2d8   :  { %1310 = vsyncpa [#allocation6], 1 }

</bundles_post_ra>
